<compile_context>
chip_gen: v7x
topology: tpu7x:2x2x1
jax: 0.10.0
libtpu: 0.0.40
codegen_flags: <defaults>
</compile_context>

<pallas_src>
import math
import functools

import jax
import jax.numpy as jnp
from jax.experimental import pallas as pl
from jax.experimental.pallas import tpu as pltpu


# ---------------------------------------------------------------------------
# Sizing helpers (per-generation VMEM budgets)
# ---------------------------------------------------------------------------
_SCRATCH_MARGIN = 4 * 1024 * 1024  # headroom for Mosaic internal scratch


def _round_up(n, m):
    return ((n + m - 1) // m) * m


def _vmem_capacity_bytes():
    """Physical VMEM per TensorCore; conservative v7x-sized default if the query fails."""
    try:
        return int(pltpu.get_tpu_info().vmem_capacity_bytes)
    except Exception:
        return 64 * 1024 * 1024


def _vmem_ceiling(vmem_cap):
    # v5e/v6e (128 MiB) -> ~108 MiB usable budget; v7x (64 MiB) -> ~54 MiB.
    return min(int(vmem_cap * 0.85), vmem_cap - 8 * 1024 * 1024)


def _fused_per_row_bytes(dims_pad):
    max_dim = max(dims_pad)
    return (2 * dims_pad[0] * 2        # double-buffered bf16 input tile
            + 2 * dims_pad[-1] * 2     # double-buffered bf16 output tile
            + 2 * max_dim * 6)         # ~2 live f32+bf16 intermediates per row


def _pick_batch_tile(B, per_row_bytes, avail_bytes, max_tb=2048):
    """Batch tile (multiple of 8 sublanes) sized against the activation VMEM budget.

    The tile is capped so the grid has >=2 steps when the batch allows it (megacore
    sharding on v7x + DMA/compute overlap), then rebalanced so the grid divides the
    padded batch exactly (batch is padded only to a multiple of 8, never to a full tile).
    """
    b8 = _round_up(max(B, 1), 8)
    tb = int(max(avail_bytes, 0) // max(per_row_bytes, 1))
    tb = max(8, min(max_tb, (tb // 8) * 8))
    half = ((b8 // 2) // 8) * 8
    if half >= 8:
        tb = min(tb, half)             # ensure at least 2 grid steps when possible
    tb = min(tb, b8)
    grid_n = -(-b8 // tb)
    tb = _round_up(-(-b8 // grid_n), 8)  # rebalance: padding waste < 8*grid_n rows
    return tb, grid_n, grid_n * tb


def _pick_div_tile(d, cap):
    """Largest multiple of 128 that divides d and is <= cap (d is a multiple of 128)."""
    best = 128
    t = 256
    while t <= min(d, cap):
        if d % t == 0:
            best = t
        t += 128
    return best


def _pad_input(x, B_pad, d_pad, B, inp_dim):
    if B_pad == B and d_pad == inp_dim:
        return x.astype(jnp.bfloat16)     # no pad pass needed, just (possibly no-op) cast
    xp = jnp.zeros((B_pad, d_pad), dtype=jnp.bfloat16)
    return xp.at[:B, :inp_dim].set(x.astype(jnp.bfloat16))


# ---------------------------------------------------------------------------
# Kernels
# ---------------------------------------------------------------------------
def _mlp_fused_kernel(*refs, num_layers):
    # refs = (x_ref, w0_ref, ..., w_{L-1}_ref, o_ref); all weights resident in VMEM.
    x_ref = refs[0]
    w_refs = refs[1:1 + num_layers]
    o_ref = refs[-1]

    h = x_ref[...]  # bf16 (tb, d0_pad)
    for li in range(num_layers):
        acc = jnp.dot(h, w_refs[li][...], preferred_element_type=jnp.float32)
        if li < num_layers - 1:
            h = jnp.maximum(acc, 0.0).astype(jnp.bfloat16)   # ReLU on f32, back to bf16
        else:
            o_ref[...] = acc.astype(o_ref.dtype)  # bf16, lane-dense store (no vst.msk)


def _linear_blocked_kernel(x_ref, w_ref, o_ref, acc_ref, *, apply_relu):
    # One Linear (+ optional ReLU) with a K-reduction grid axis and f32 VMEM accumulator.
    @pl.when(pl.program_id(2) == 0)
    def _():
        acc_ref[...] = jnp.zeros_like(acc_ref)

    acc_ref[...] += jnp.dot(x_ref[...], w_ref[...], preferred_element_type=jnp.float32)

    @pl.when(pl.program_id(2) == pl.num_programs(2) - 1)
    def _():
        acc = acc_ref[...]
        if apply_relu:
            acc = jnp.maximum(acc, 0.0)
        o_ref[...] = acc.astype(o_ref.dtype)


# ---------------------------------------------------------------------------
# Host-side wrappers
# ---------------------------------------------------------------------------
def prepare_densenet_params(weights_t):
    """Pad feature dims to the 128-lane width and cast to bf16 ONCE (call at init time,
    not per forward), so the forward wrapper does no per-call weight HBM passes."""
    dims = [int(weights_t[0].shape[0])] + [int(w.shape[1]) for w in weights_t]
    dims_pad = [_round_up(d, 128) for d in dims]
    w_pad = []
    for li, w in enumerate(weights_t):
        wp = jnp.zeros((dims_pad[li], dims_pad[li + 1]), dtype=jnp.bfloat16)
        wp = wp.at[:w.shape[0], :w.shape[1]].set(w.astype(jnp.bfloat16))
        w_pad.append(wp)
    return {"w_pad": tuple(w_pad), "dims": tuple(dims), "dims_pad": tuple(dims_pad)}


def _blocked_linear(h, w, *, apply_relu, tm, ceiling):
    Bp, K = h.shape
    _, N = w.shape
    tn = _pick_div_tile(N, 512)
    tk = _pick_div_tile(K, 1024)
    grid = (Bp // tm, N // tn, K // tk)

    need = (2 * tm * tk * 2 + 2 * tk * tn * 2 + 2 * tm * tn * 2
            + tm * tn * 4 + _SCRATCH_MARGIN)
    vmem_limit = int(min(max(need, 16 * 1024 * 1024), ceiling))
    cost = pl.CostEstimate(flops=2 * Bp * K * N, transcendentals=0,
                           bytes_accessed=int(Bp * K * 2 + K * N * 2 + Bp * N * 2))

    kernel = functools.partial(_linear_blocked_kernel, apply_relu=apply_relu)
    return pl.pallas_call(
        kernel,
        out_shape=jax.ShapeDtypeStruct((Bp, N), jnp.bfloat16),
        grid_spec=pltpu.PrefetchScalarGridSpec(
            num_scalar_prefetch=0,
            grid=grid,
            in_specs=[pl.BlockSpec((tm, tk), lambda i, j, k: (i, k)),
                      pl.BlockSpec((tk, tn), lambda i, j, k: (k, j))],
            out_specs=pl.BlockSpec((tm, tn), lambda i, j, k: (i, j)),
            scratch_shapes=[pltpu.VMEM((tm, tn), jnp.float32)],
        ),
        compiler_params=pltpu.CompilerParams(
            dimension_semantics=("parallel", "parallel", "arbitrary"),
            vmem_limit_bytes=vmem_limit,
        ),
        cost_estimate=cost,
    )(h, w)


def densenet_forward(x, params, *, max_batch_tile=None, force_blocked=False):
    """x: (B, inp_dim) f32 (or bf16).  params: output of prepare_densenet_params.

    Returns (B, out_dim) f32.
    """
    w_pad = params["w_pad"]
    dims = params["dims"]
    dims_pad = params["dims_pad"]
    num_layers = len(w_pad)
    B, inp_dim = x.shape
    assert inp_dim == dims[0], (inp_dim, dims[0])
    out_dim = dims[-1]

    weight_bytes = sum(int(w.size) * 2 for w in w_pad)
    ceiling = _vmem_ceiling(_vmem_capacity_bytes())

    per_row = _fused_per_row_bytes(dims_pad)
    act_budget = ceiling - weight_bytes - _SCRATCH_MARGIN
    # Fused path keeps all weights resident in VMEM; require room for at least a 64-row
    # batch tile of activations, otherwise degrade to the per-layer blocked pipeline
    # (e.g. weight sets that fit v5e/v6e's 128 MiB but not v7x's 64 MiB per TC).
    use_fused = (not force_blocked) and act_budget >= per_row * 64

    if use_fused:
        tb, grid_n, B_pad = _pick_batch_tile(B, per_row, act_budget,
                                             max_tb=max_batch_tile or 2048)
        x_in = _pad_input(x, B_pad, dims_pad[0], B, inp_dim)

        in_specs = [pl.BlockSpec((tb, dims_pad[0]), lambda i: (i, 0))]
        for _ in w_pad:
            # Grid-invariant weights: single resident VMEM copy, no double buffering.
            in_specs.append(pl.BlockSpec(memory_space=pltpu.MemorySpace.VMEM))
        out_spec = pl.BlockSpec((tb, dims_pad[-1]), lambda i: (i, 0))

        flops = 2 * B_pad * sum(dims_pad[i] * dims_pad[i + 1] for i in range(num_layers))
        bytes_accessed = (B_pad * dims_pad[0] * 2 + weight_bytes
                          + B_pad * dims_pad[-1] * 2)
        cost = pl.CostEstimate(flops=int(flops), transcendentals=0,
                               bytes_accessed=int(bytes_accessed))

        need = (weight_bytes                         # single resident weight copy
                + 2 * tb * dims_pad[0] * 2           # double-buffered bf16 x tile
                + 2 * tb * dims_pad[-1] * 2          # double-buffered bf16 out tile
                + 2 * tb * max(dims_pad) * 6         # ~2 live f32+bf16 intermediates
                + _SCRATCH_MARGIN)
        vmem_limit = int(min(max(need, 16 * 1024 * 1024), ceiling))

        kernel = functools.partial(_mlp_fused_kernel, num_layers=num_layers)
        out = pl.pallas_call(
            kernel,
            out_shape=jax.ShapeDtypeStruct((B_pad, dims_pad[-1]), jnp.bfloat16),
            grid_spec=pltpu.PrefetchScalarGridSpec(
                num_scalar_prefetch=0,
                grid=(grid_n,),
                in_specs=in_specs,
                out_specs=out_spec,
            ),
            compiler_params=pltpu.CompilerParams(
                dimension_semantics=("parallel",),
                vmem_limit_bytes=vmem_limit,
            ),
            cost_estimate=cost,
        )(x_in, *w_pad)
    else:
        # Weight-blocked fallback: per-layer tiled matmul+ReLU with pipelined weight DMA.
        max_dim = max(dims_pad)
        per_row_blk = (2 * min(1024, max_dim) * 2 + 2 * min(512, max_dim) * 2
                       + min(512, max_dim) * 4)
        wtile_bytes = 2 * min(1024, max_dim) * min(512, max_dim) * 2
        avail = ceiling - _SCRATCH_MARGIN - wtile_bytes
        tm, _, B_pad = _pick_batch_tile(B, per_row_blk, avail,
                                        max_tb=max_batch_tile or 512)
        h = _pad_input(x, B_pad, dims_pad[0], B, inp_dim)
        for li in range(num_layers):
            h = _blocked_linear(h, w_pad[li], apply_relu=(li < num_layers - 1),
                                tm=tm, ceiling=ceiling)
        out = h

    return out[:B, :out_dim].astype(jnp.float32)


# ---------------------------------------------------------------------------
# Parameter init matching the PyTorch module's __init__
# ---------------------------------------------------------------------------
def init_densenet_params(key, inp_dim, hdims, outp_dim, scaling=1.0,
                         linear_readout=False):
    """Each Linear weight ~ Normal(0, scaling*sqrt(2/_in)), bias=False (module default).
       Returns weights already transposed to (in_dim, out_dim)."""
    hdims = hdims or []
    dims_in = [inp_dim] + hdims
    dims_out = hdims + [outp_dim]
    weights_t = []
    for _in, _out in zip(dims_in, dims_out):
        key, sub = jax.random.split(key)
        std = scaling * math.sqrt(2.0 / _in)
        w = jax.random.normal(sub, (_out, _in), dtype=jnp.float32) * std  # PyTorch (out,in)
        weights_t.append(w.T)  # store as (in, out) for x @ W
    if linear_readout:
        weights_t[-1] = jnp.zeros_like(weights_t[-1])
    return weights_t


def densenet_reference(x, weights_t):
    """Mirrors the kernel math: bf16 operands, f32 accumulation, ReLU, bf16 readout store."""
    h = x.astype(jnp.bfloat16)
    n = len(weights_t)
    for li, w in enumerate(weights_t):
        acc = jnp.dot(h, w.astype(jnp.bfloat16), preferred_element_type=jnp.float32)
        if li < n - 1:
            h = jnp.maximum(acc, 0.0).astype(jnp.bfloat16)
        else:
            return acc.astype(jnp.bfloat16).astype(jnp.float32)
    return h.astype(jnp.float32)


if __name__ == "__main__":
    key = jax.random.PRNGKey(0)
    k_x, k_w = jax.random.split(key)

    # Small shapes consistent with the module: DenseNet(inp_dim=16, hdims=[32, 32], outp_dim=1)
    B, inp_dim, hdims, outp_dim = 8, 16, [32, 32], 1
    x = jax.random.normal(k_x, (B, inp_dim), dtype=jnp.float32)
    weights_t = init_densenet_params(k_w, inp_dim, hdims, outp_dim,
                                     scaling=1.0, linear_readout=False)
    params = prepare_densenet_params(weights_t)

    ref = densenet_reference(x, weights_t)

    # Fused (weights-resident) path.
    out = jax.block_until_ready(densenet_forward(x, params))
    assert out.shape == (B, outp_dim), out.shape
    err = jnp.max(jnp.abs(out - ref))
    assert jnp.allclose(out, ref, atol=1e-2, rtol=1e-2), f"fused mismatch: max abs err {err}"

    # Also exercise the weight-blocked fallback (used when resident weights would
    # overflow the per-generation VMEM budget, e.g. large models on v7x).
    out_blk = jax.block_until_ready(densenet_forward(x, params, force_blocked=True))
    assert out_blk.shape == (B, outp_dim), out_blk.shape
    err_blk = jnp.max(jnp.abs(out_blk - ref))
    assert jnp.allclose(out_blk, ref, atol=1e-2, rtol=1e-2), (
        f"blocked mismatch: max abs err {err_blk}")

    print("KERNEL_OK")
</pallas_src>

<mosaic_0001>
module attributes {stable_mosaic.version = 11 : i64} {
  func.func @_mlp_fused_kernel(%arg0: i32, %arg1: memref<8x128xbf16, #tpu.memory_space<vmem>>, %arg2: memref<128x128xbf16, #tpu.memory_space<vmem>>, %arg3: memref<128x128xbf16, #tpu.memory_space<vmem>>, %arg4: memref<128x128xbf16, #tpu.memory_space<vmem>>, %arg5: memref<8x128xbf16, #tpu.memory_space<vmem>>) attributes {dimension_semantics = [#tpu.dimension_semantics<parallel>], iteration_bounds = array<i64: 1>, scalar_prefetch = 0 : i64, scratch_operands = 0 : i64, tpu.core_type = #tpu.core_type<tc>, window_params = [{transform_indices = @transform_0, window_bounds = array<i64: 8, 128>}, {pipeline_mode = #tpu.pipeline_mode<synchronous>, transform_indices = @transform_1, window_bounds = array<i64: 128, 128>}, {pipeline_mode = #tpu.pipeline_mode<synchronous>, transform_indices = @transform_2, window_bounds = array<i64: 128, 128>}, {pipeline_mode = #tpu.pipeline_mode<synchronous>, transform_indices = @transform_3, window_bounds = array<i64: 128, 128>}, {transform_indices = @transform_4, window_bounds = array<i64: 8, 128>}]} {
    %c0 = arith.constant 0 : index
    %c0_0 = arith.constant 0 : index
    %0 = vector.load %arg1[%c0, %c0_0] : memref<8x128xbf16, #tpu.memory_space<vmem>>, vector<8x128xbf16>
    %c0_1 = arith.constant 0 : index
    %c0_2 = arith.constant 0 : index
    %1 = vector.load %arg2[%c0_1, %c0_2] : memref<128x128xbf16, #tpu.memory_space<vmem>>, vector<128x128xbf16>
    %cst = arith.constant dense<0.000000e+00> : vector<8x128xf32>
    %2 = tpu.matmul %0, %1, %cst {dimension_numbers = #tpu.dot_dimension_numbers<[1], [0], [0], [1], [0, 0, 1, 1], [], []>} : vector<8x128xbf16>, vector<128x128xbf16>, vector<8x128xf32> -> vector<8x128xf32>
    %cst_3 = arith.constant 0.000000e+00 : f32
    %3 = vector.broadcast %cst_3 : f32 to vector<8x128xf32>
    %4 = arith.maximumf %2, %3 : vector<8x128xf32>
    %5 = arith.truncf %4 : vector<8x128xf32> to vector<8x128xbf16>
    %c0_4 = arith.constant 0 : index
    %c0_5 = arith.constant 0 : index
    %6 = vector.load %arg3[%c0_4, %c0_5] : memref<128x128xbf16, #tpu.memory_space<vmem>>, vector<128x128xbf16>
    %cst_6 = arith.constant dense<0.000000e+00> : vector<8x128xf32>
    %7 = tpu.matmul %5, %6, %cst_6 {dimension_numbers = #tpu.dot_dimension_numbers<[1], [0], [0], [1], [0, 0, 1, 1], [], []>} : vector<8x128xbf16>, vector<128x128xbf16>, vector<8x128xf32> -> vector<8x128xf32>
    %cst_7 = arith.constant 0.000000e+00 : f32
    %8 = vector.broadcast %cst_7 : f32 to vector<8x128xf32>
    %9 = arith.maximumf %7, %8 : vector<8x128xf32>
    %10 = arith.truncf %9 : vector<8x128xf32> to vector<8x128xbf16>
    %c0_8 = arith.constant 0 : index
    %c0_9 = arith.constant 0 : index
    %11 = vector.load %arg4[%c0_8, %c0_9] : memref<128x128xbf16, #tpu.memory_space<vmem>>, vector<128x128xbf16>
    %cst_10 = arith.constant dense<0.000000e+00> : vector<8x128xf32>
    %12 = tpu.matmul %10, %11, %cst_10 {dimension_numbers = #tpu.dot_dimension_numbers<[1], [0], [0], [1], [0, 0, 1, 1], [], []>} : vector<8x128xbf16>, vector<128x128xbf16>, vector<8x128xf32> -> vector<8x128xf32>
    %13 = arith.truncf %12 : vector<8x128xf32> to vector<8x128xbf16>
    %c0_11 = arith.constant 0 : index
    %c0_12 = arith.constant 0 : index
    %14 = vector.load %arg5[%c0_11, %c0_12] : memref<8x128xbf16, #tpu.memory_space<vmem>>, vector<8x128xbf16>
    tpu.vector_store %arg5[%c0_11, %c0_12], %13 {strides = array<i32>} : memref<8x128xbf16, #tpu.memory_space<vmem>>, vector<8x128xbf16>,
    return
  }
  func.func @transform_0(%arg0: i32) -> (i32, i32) {
    %c0_i32 = arith.constant 0 : i32
    %c0_i32_0 = arith.constant 0 : i32
    return %arg0, %c0_i32 : i32, i32
  }
  func.func @transform_1(%arg0: i32) -> (i32, i32) {
    %c0_i32 = arith.constant 0 : i32
    %c0_i32_0 = arith.constant 0 : i32
    %c0_i32_1 = arith.constant 0 : i32
    return %c0_i32, %c0_i32_0 : i32, i32
  }
  func.func @transform_2(%arg0: i32) -> (i32, i32) {
    %c0_i32 = arith.constant 0 : i32
    %c0_i32_0 = arith.constant 0 : i32
    %c0_i32_1 = arith.constant 0 : i32
    return %c0_i32, %c0_i32_0 : i32, i32
  }
  func.func @transform_3(%arg0: i32) -> (i32, i32) {
    %c0_i32 = arith.constant 0 : i32
    %c0_i32_0 = arith.constant 0 : i32
    %c0_i32_1 = arith.constant 0 : i32
    return %c0_i32, %c0_i32_0 : i32, i32
  }
  func.func @transform_4(%arg0: i32) -> (i32, i32) {
    %c0_i32 = arith.constant 0 : i32
    %c0_i32_0 = arith.constant 0 : i32
    return %arg0, %c0_i32 : i32, i32
  }
}

</mosaic_0001>

<bundles_post_ra>
// kernel: tpu_custom_call.1
= control target key start
LH: loop header
LB: loop body
LE: loop exit
PB: predicated region body
PF: predicated region fallthrough
CT: control target
= control target key end

     0   :  { %9 = vsyncpa [#allocation3], 0  ;;  %s803_s0 = inlined_call_operand.hbm [shape: bf16[8,128], index: 0, kind: input, shape index: {}]   ;;  %s804_s1 = inlined_call_operand.hbm [shape: bf16[128,128], index: 1, kind: input, shape index: {}]   ;;  %s805_s2 = inlined_call_operand.hbm [shape: bf16[128,128], index: 2, kind: input, shape index: {}]   ;;  %s806_s3 = inlined_call_operand.hbm [shape: bf16[128,128], index: 3, kind: input, shape index: {}]   ;;  %s807_s4 = inlined_call_operand.hbm [shape: bf16[8,128], index: 4, kind: output, shape index: {}]  }
   0x1   :  { %10 = vsyncpa [#allocation6], 0 }
   0x2   :  { %11 = vsyncpa [#allocation9], 0 }
   0x3   :  { %12 = vsyncpa [#allocation4], 0  ;;  %s670_s15 = smov [#allocation5]   ;;  %s552_s19 = scalar_lea.hbm %s804_s1, 1024 }
   0x4   :  { %s28_s16 = sshll.u32 %s670_s15, 4  ;;  %p553_p0 = scmp.ne.s32.totalorder %s804_s1, %s552_s19  ;;  %s29_s16 = int_to_ptr.vmem [resolvable:$true] %s28_s16 }
   0x5   :  { %p556_p1 = scmp.lt.u32.totalorder %s552_s19, %s804_s1 }
   0x7   :  { %p558_p2 = pnand %p556_p1, %p553_p0 }
   0x9   :  { %561 = shalt.err (!%p558_p2)
}
   0xa   :  { %s562_s24 = scalar_lea.vmem %s29_s16, 1024  ;;  %p567_p4 = scmp.lt.s32.totalorder %s29_s16, %s29_s16 }
   0xb   :  { %p563_p3 = scmp.ne.s32.totalorder %s29_s16, %s562_s24  ;;  %p568_p5 = scmp.lt.s32.totalorder %s562_s24, %s562_s24 }
   0xd   :  { %p569_p6 = por %p568_p5, %p567_p4 }
   0xf   :  { %p570_p7 = pnand %p569_p6, %p563_p3 }
  0x11   :  { %573 = shalt.err (!%p570_p7)
}
  0x12   :  { %s671_s25 = smov 64   ;;  %s672_s26 = smov 4  }
  0x13   :  { %34 = dma.hbm_to_vmem [thread:$0]  %s804_s1, 1024, %s29_s16, [#allocation6], %s671_s25, %s671_s25, %s672_s26  }
  0x14   :  { %s673_s29 = smov [#allocation2]   ;;  %s674_s5 = smov [#allocation7]  }
  0x15   :  { %s19_s30 = sshll.u32 %s673_s29, 4  ;;  %s40_s6 = sshll.u32 %s674_s5, 4  ;;  %s20_s30 = int_to_ptr.vmem [resolvable:$true] %s19_s30  ;;  %s41_s6 = int_to_ptr.vmem [resolvable:$true] %s40_s6 }
  0x16   :  { %s574_s9 = scalar_lea.hbm %s803_s0, 64 }
  0x17   :  { %p575_p8 = scmp.ne.s32.totalorder %s803_s0, %s574_s9  ;;  %p578_p9 = scmp.lt.u32.totalorder %s574_s9, %s803_s0 }
  0x19   :  { %p580_p10 = pnand %p578_p9, %p575_p8 }
  0x1b   :  { %583 = shalt.err (!%p580_p10)
}
  0x1c   :  { %s584_s1 = scalar_lea.vmem %s20_s30, 64  ;;  %p589_p12 = scmp.lt.s32.totalorder %s20_s30, %s20_s30 }
  0x1d   :  { %p585_p11 = scmp.ne.s32.totalorder %s20_s30, %s584_s1  ;;  %p590_p13 = scmp.lt.s32.totalorder %s584_s1, %s584_s1 }
  0x1f   :  { %p591_p0 = por %p590_p13, %p589_p12 }
  0x21   :  { %p592_p1 = pnand %p591_p0, %p585_p11 }
  0x23   :  { %595 = shalt.err (!%p592_p1)
}
  0x24   :  { %22 = dma.hbm_to_vmem [thread:$0]  %s803_s0, 64, %s20_s30, [#allocation3]  }
  0x25   :  { %s596_s18 = scalar_lea.hbm %s805_s2, 1024 }
  0x26   :  { %p597_p2 = scmp.ne.s32.totalorder %s805_s2, %s596_s18  ;;  %p600_p3 = scmp.lt.u32.totalorder %s596_s18, %s805_s2 }
  0x28   :  { %p602_p4 = pnand %p600_p3, %p597_p2 }
  0x2a   :  { %605 = shalt.err (!%p602_p4)
}
  0x2b   :  { %s606_s23 = scalar_lea.vmem %s41_s6, 1024  ;;  %p611_p6 = scmp.lt.s32.totalorder %s41_s6, %s41_s6 }
  0x2c   :  { %p607_p5 = scmp.ne.s32.totalorder %s41_s6, %s606_s23  ;;  %p612_p7 = scmp.lt.s32.totalorder %s606_s23, %s606_s23 }
  0x2e   :  { %p613_p8 = por %p612_p7, %p611_p6 }
  0x30   :  { %p614_p9 = pnand %p613_p8, %p607_p5 }
  0x32   :  { %617 = shalt.err (!%p614_p9)
}
  0x33   :  { %46 = dma.hbm_to_vmem [thread:$0]  %s805_s2, 1024, %s41_s6, [#allocation6], %s671_s25, %s671_s25, %s672_s26  }
  0x34   :  { %s675_s27 = smov [#allocation8]   ;;  %s618_s5 = scalar_lea.hbm %s806_s3, 1024 }
  0x35   :  { %s52_s28 = sshll.u32 %s675_s27, 4  ;;  %p619_p10 = scmp.ne.s32.totalorder %s806_s3, %s618_s5  ;;  %s53_s28 = int_to_ptr.vmem [resolvable:$true] %s52_s28 }
  0x36   :  { %p622_p11 = scmp.lt.u32.totalorder %s618_s5, %s806_s3 }
  0x38   :  { %p624_p12 = pnand %p622_p11, %p619_p10 }
  0x3a   :  { %627 = shalt.err (!%p624_p12)
}
  0x3b   :  { %s628_s11 = scalar_lea.vmem %s53_s28, 1024  ;;  %p633_p0 = scmp.lt.s32.totalorder %s53_s28, %s53_s28 }
  0x3c   :  { %p629_p13 = scmp.ne.s32.totalorder %s53_s28, %s628_s11  ;;  %p634_p1 = scmp.lt.s32.totalorder %s628_s11, %s628_s11 }
  0x3e   :  { %p635_p2 = por %p634_p1, %p633_p0 }
  0x40   :  { %p636_p3 = pnand %p635_p2, %p629_p13 }
  0x42   :  { %639 = shalt.err (!%p636_p3)
}
  0x43   :  { %58 = dma.hbm_to_vmem [thread:$0]  %s806_s3, 1024, %s53_s28, [#allocation9], %s671_s25, %s671_s25, %s672_s26  }
  0x44   :  { %662 = dma.done.wait [#allocation3], 64  }
  0x45   :  { %663 = vsyncadd [#allocation3], 4294967232 }
  0x46   :  { %664 = dma.done.wait [#allocation6], 2048  }
  0x47   :  { %665 = vsyncadd [#allocation6], 4294965248 }
  0x48   :  { %666 = dma.done.wait [#allocation9], 1024  }
  0x49   :  { %667 = vsyncadd [#allocation9], 4294966272  ;;  %v676_v0 = vmov 0.0   ;;  %vm677_vm0 = vmmov 0   ;;  %v528_v1 = vld [vmem:[#allocation5] sm:$0xff]   ;;  %v529_v2 = vld [vmem:[#allocation5 + $0x8] sm:$0xff]  }
  0x4a   :  { %459 = vmatprep.subr.bf16.mxu0 %v676_v0  ;;  %475 = vmatprep.mubr.msk.bf16.mxu0 %vm677_vm0, %v676_v0  ;;  %v530_v3 = vld [vmem:[#allocation5 + $0x10] sm:$0xff]   ;;  %v536_v4 = vld [vmem:[#allocation7] sm:$0xff]   ;;  %v531_v5 = vld [vmem:[#allocation5 + $0x18] sm:$0xff]   ;;  %s678_s3 = smov [#allocation10]  }
  0x4b   :  { %479 = vmatprep.subr.bf16.mxu1 %v676_v0  ;;  %495 = vmatprep.mubr.msk.bf16.mxu1 %vm677_vm0, %v676_v0  ;;  %v537_v6 = vld [vmem:[#allocation7 + $0x8] sm:$0xff]   ;;  %v532_v7 = vld [vmem:[#allocation5 + $0x20] sm:$0xff]   ;;  %v538_v8 = vld [vmem:[#allocation7 + $0x10] sm:$0xff]   ;;  %s397_s25 = sshll.u32 %s678_s3, 4  ;;  %s398_s25 = int_to_ptr.vmem [resolvable:$true] %s397_s25 }
  0x4c   :  { %460 = vmatpush3.bf16.msra.mxu0 %v528_v1  ;;  %480 = vmatpush3.bf16.msra.mxu1 %v536_v4  ;;  %v533_v9 = vld [vmem:[#allocation5 + $0x28] sm:$0xff]   ;;  %v539_v10 = vld [vmem:[#allocation7 + $0x18] sm:$0xff]   ;;  %v534_v11 = vld [vmem:[#allocation5 + $0x30] sm:$0xff]   ;;  %s640_s26 = scalar_lea.vmem %s398_s25, 64  ;;  %p645_p5 = scmp.lt.s32.totalorder %s398_s25, %s398_s25 }
  0x4d   :  { %461 = vmatprep.subr.bf16.mxu0 %v676_v0  ;;  %481 = vmatprep.subr.bf16.mxu1 %v676_v0  ;;  %v540_v12 = vld [vmem:[#allocation7 + $0x20] sm:$0xff]   ;;  %v535_v13 = vld [vmem:[#allocation5 + $0x38] sm:$0xff]   ;;  %v541_v14 = vld [vmem:[#allocation7 + $0x28] sm:$0xff]   ;;  %p641_p4 = scmp.ne.s32.totalorder %s398_s25, %s640_s26  ;;  %p646_p6 = scmp.lt.s32.totalorder %s640_s26, %s640_s26 }
  0x4e   :  { %v72_v15 = vld [vmem:[#allocation2] sm:$0xf]  ;;  %v542_v16 = vld [vmem:[#allocation7 + $0x30] sm:$0xff]   ;;  %v544_v18 = vld [vmem:[#allocation8] sm:$0xff]  }
  0x4f   :  { %v543_v17 = vld [vmem:[#allocation7 + $0x38] sm:$0xff]   ;;  %v545_v19 = vld [vmem:[#allocation8 + $0x8] sm:$0xff]   ;;  %v546_v20 = vld [vmem:[#allocation8 + $0x10] sm:$0xff]   ;;  %p647_p7 = por %p646_p6, %p645_p5 }
  0x50   :  { %462 = vmatpush3.bf16.msra.mxu0 %v529_v2  ;;  %482 = vmatpush3.bf16.msra.mxu1 %v537_v6  ;;  %v547_v21 = vld [vmem:[#allocation8 + $0x18] sm:$0xff]   ;;  %v548_v22 = vld [vmem:[#allocation8 + $0x20] sm:$0xff]   ;;  %v549_v23 = vld [vmem:[#allocation8 + $0x28] sm:$0xff]  }
  0x51   :  { %463 = vmatprep.subr.bf16.mxu0 %v676_v0  ;;  %483 = vmatprep.subr.bf16.mxu1 %v676_v0  ;;  %v550_v24 = vld [vmem:[#allocation8 + $0x30] sm:$0xff]   ;;  %v551_v31 = vld [vmem:[#allocation8 + $0x38] sm:$0xff]   ;;  %p648_p8 = pnand %p647_p7, %p641_p4 }
  0x54   :  { %464 = vmatpush3.bf16.msra.mxu0 %v530_v3  ;;  %484 = vmatpush3.bf16.msra.mxu1 %v538_v8 }
  0x55   :  { %465 = vmatprep.subr.bf16.mxu0 %v676_v0  ;;  %485 = vmatprep.subr.bf16.mxu1 %v676_v0 }
  0x58   :  { %466 = vmatpush3.bf16.msra.mxu0 %v531_v5  ;;  %486 = vmatpush3.bf16.msra.mxu1 %v539_v10 }
  0x59   :  { %467 = vmatprep.subr.bf16.mxu0 %v676_v0  ;;  %487 = vmatprep.subr.bf16.mxu1 %v676_v0 }
  0x5c   :  { %468 = vmatpush3.bf16.msra.mxu0 %v532_v7  ;;  %488 = vmatpush3.bf16.msra.mxu1 %v540_v12 }
  0x5d   :  { %469 = vmatprep.subr.bf16.mxu0 %v676_v0  ;;  %489 = vmatprep.subr.bf16.mxu1 %v676_v0 }
  0x60   :  { %470 = vmatpush3.bf16.msra.mxu0 %v533_v9  ;;  %490 = vmatpush3.bf16.msra.mxu1 %v541_v14 }
  0x61   :  { %471 = vmatprep.subr.bf16.mxu0 %v676_v0  ;;  %491 = vmatprep.subr.bf16.mxu1 %v676_v0 }
  0x64   :  { %472 = vmatpush3.bf16.msra.mxu0 %v534_v11  ;;  %492 = vmatpush3.bf16.msra.mxu1 %v542_v16 }
  0x65   :  { %473 = vmatprep.subr.bf16.mxu0 %v676_v0  ;;  %493 = vmatprep.subr.bf16.mxu1 %v676_v0 }
  0x68   :  { %474 = vmatpush3.bf16.msra.mxu0 %v535_v13  ;;  %494 = vmatpush3.bf16.msra.mxu1 %v543_v17 }
  0x69   :  { %499 = vmatprep.subr.bf16.mxu0 %v676_v0 }
  0x6b   :  { %476 = vmatmul.mubr.bf16.vlgmr.msra.gmra.mrb[0].mxu0 %v72_v15 }
  0x6c   :  { %515 = vmatprep.mubr.msk.bf16.mxu0 %vm677_vm0, %v676_v0  ;;  %500 = vmatpush3.bf16.msra.mxu0 %v544_v18 }
  0x6d   :  { %501 = vmatprep.subr.bf16.mxu0 %v676_v0 }
  0x70   :  { %502 = vmatpush3.bf16.msra.mxu0 %v545_v19 }
  0x71   :  { %503 = vmatprep.subr.bf16.mxu0 %v676_v0 }
  0x74   :  { %504 = vmatpush3.bf16.msra.mxu0 %v546_v20 }
  0x75   :  { %505 = vmatprep.subr.bf16.mxu0 %v676_v0 }
  0x78   :  { %506 = vmatpush3.bf16.msra.mxu0 %v547_v21 }
  0x79   :  { %507 = vmatprep.subr.bf16.mxu0 %v676_v0 }
  0x7c   :  { %508 = vmatpush3.bf16.msra.mxu0 %v548_v22 }
  0x7d   :  { %509 = vmatprep.subr.bf16.mxu0 %v676_v0 }
  0x80   :  { %510 = vmatpush3.bf16.msra.mxu0 %v549_v23 }
  0x81   :  { %511 = vmatprep.subr.bf16.mxu0 %v676_v0 }
  0x84   :  { %512 = vmatpush3.bf16.msra.mxu0 %v550_v24 }
  0x85   :  { %513 = vmatprep.subr.bf16.mxu0 %v676_v0 }
  0x88   :  { %514 = vmatpush3.bf16.msra.mxu0 %v551_v31 }
 0x13e   :  { %v171_v25 = vpop.f32.mrb[0].mxu0 }
 0x13f   :  { %v177_v26 = vmax.f32 %v171_v25, 0.0  ;;  %v477_v27 = vpop.f32.mrb[1].mxu0 }
 0x140   :  { %v174_v28 = vpop.f32.mrb[2].mxu0 }
 0x141   :  { %v178_v29 = vpack.c.bf16 %v177_v26, %v177_v26  ;;  %v478_v30 = vpop.f32.mrb[3].mxu0 }
 0x143   :  { %496 = vmatmul.mubr.bf16.vlgmr.msra.gmra.mrb[0].mxu1 %v178_v29 }
 0x216   :  { %v277_v32 = vpop.f32.mrb[0].mxu1 }
 0x217   :  { %v283_v33 = vmax.f32 %v277_v32, 0.0  ;;  %v497_v34 = vpop.f32.mrb[1].mxu1 }
 0x218   :  { %v280_v35 = vpop.f32.mrb[2].mxu1 }
 0x219   :  { %v284_v36 = vpack.c.bf16 %v283_v33, %v283_v33  ;;  %v498_v37 = vpop.f32.mrb[3].mxu1 }
 0x21b   :  { %516 = vmatmul.mubr.bf16.vlgmr.msra.gmra.mrb[4].mxu0 %v284_v36 }
 0x2ee   :  { %v383_v38 = vpop.f32.mrb[4].mxu0 }
 0x2ef   :  { %v389_v39 = vpack.c.bf16 %v383_v38, %v383_v38  ;;  %v517_v40 = vpop.f32.mrb[5].mxu0 }
 0x2f0   :  { %v386_v41 = vpop.f32.mrb[6].mxu0 }
 0x2f1   :  { %390 = vst [vmem:[#allocation10] sm:$0xf] %v389_v39  ;;  %v518_v42 = vpop.f32.mrb[7].mxu0 }
 0x2f2   :  { %651 = shalt.err (!%p648_p8)
}
 0x2f3   :  { %s652_s1 = scalar_lea.hbm %s807_s4, 64 }
 0x2f4   :  { %p653_p9 = scmp.ne.s32.totalorder %s807_s4, %s652_s1  ;;  %p656_p10 = scmp.lt.u32.totalorder %s652_s1, %s807_s4 }
 0x2f6   :  { %p658_p11 = pnand %p656_p10, %p653_p9 }
 0x2f8   :  { %661 = shalt.err (!%p658_p11)
}
 0x2f9   :  { %400 = dma.vmem_to_hbm [thread:$0]  %s398_s25, 64, %s807_s4, [#allocation4]  }
 0x2fa   :  { %668 = dma.done.wait [#allocation4], 64  }
 0x2fb   :  { %669 = vsyncadd [#allocation4], 4294967232 }
 0x2fc   :  { %404 = vsyncpa [#allocation3], 1 }
 0x2fd   :  { %405 = vsyncpa [#allocation6], 1 }
 0x2fe   :  { %406 = vsyncpa [#allocation9], 1 }
 0x2ff   :  { %407 = vsyncpa [#allocation4], 1 }

</bundles_post_ra>
